<compile_context>
chip_gen: v5e
topology: v5e:2x2
jax: 0.10.0
libtpu: 0.0.40
codegen_flags: <defaults>
</compile_context>

<pallas_src>
import jax
import jax.numpy as jnp
import numpy as np
from jax.experimental import pallas as pl
from jax.experimental.pallas import tpu as pltpu


def _round_up(x, m):
    return (x + m - 1) // m * m


def _cumsum_block_size():
    """MXU-native cumsum block: 128 on v5e (4x128^2 MXU), 256 on v6e/v7x (2x256^2)."""
    try:
        kind = jax.devices()[0].device_kind.lower()
    except Exception:
        return 256
    if "v5 lite" in kind or "v5lite" in kind or "v5e" in kind:
        return 128
    return 256


# ----------------------------------------------------------------------------
# Kernel 1: fused softmax over classes + one-hot error, emitted as the sort key
#           nkey = -|onehot(label) - softmax(logits)|   (0 on padded pixels)
# layout: logits [B, C, Pp] f32, labels [B, 1, Pp] i32 (padded pixels labelled -1)
# ----------------------------------------------------------------------------
def _softmax_err_kernel(logits_ref, labels_ref, nkey_ref):
    logits = logits_ref[0]                          # [C, T] f32
    lbl = labels_ref[0]                             # [1, T] i32
    C, T = logits.shape
    m = jnp.max(logits, axis=0, keepdims=True)      # [1, T]
    e = jnp.exp(logits - m)
    s = jnp.sum(e, axis=0, keepdims=True)
    inv = pl.reciprocal(s, approx=True)             # EUP estimate (~2^-12 rel err)
    inv = inv * (2.0 - s * inv)                     # one Newton step -> ~f32 accurate
    probas = e * inv                                # softmax over classes
    cls = jax.lax.broadcasted_iota(jnp.int32, (C, T), 0)
    fg = (cls == lbl).astype(jnp.float32)           # one-hot ground truth
    err = jnp.abs(fg - probas)
    valid = lbl >= 0                                # [1, T], False on padded pixels
    nkey_ref[0] = jnp.where(valid, -err, 0.0)       # ascending-sort key == descending err


def softmax_err(logits3, labels3, tile_p):
    B, C, Pp = logits3.shape
    return pl.pallas_call(
        _softmax_err_kernel,
        out_shape=jax.ShapeDtypeStruct((B, C, Pp), jnp.float32),
        grid=(B, Pp // tile_p),
        in_specs=[pl.BlockSpec((1, C, tile_p), lambda b, i: (b, 0, i)),
                  pl.BlockSpec((1, 1, tile_p), lambda b, i: (b, 0, i))],
        out_specs=pl.BlockSpec((1, C, tile_p), lambda b, i: (b, 0, i)),
        compiler_params=pltpu.CompilerParams(
            dimension_semantics=("parallel", "parallel"),
            vmem_limit_bytes=48 * 1024 * 1024),
    )(logits3, labels3)


# ----------------------------------------------------------------------------
# Kernel 2: per-(batch, class) Lovasz gradient + dot product, tiled over
#           (row groups of bc_tile) x (pixel tiles of tile_p).
# nkey [BCp, Pp] f32  (row r = b*C + c, sorted so err = -nkey is descending)
# fg   [BCp, Pp] i8   (one-hot gt carried through the same sort)
# gts  [BCp, 1]  f32  (foreground pixel counts)
# tri  [tp, tp]  bf16 (upper triangular: tri[j, i] = 1 iff j <= i)
# out  [BCp, 1]  f32  (per-row loss; present mask + averaging done in JAX)
# ----------------------------------------------------------------------------
def _lovasz_rows_kernel(nkey_ref, fg_ref, gts_ref, tri_ref, out_ref,
                        cs_ref, jprev_ref):
    t = pl.program_id(1)

    @pl.when(t == 0)
    def _():
        cs_ref[...] = jnp.zeros_like(cs_ref)
        jprev_ref[...] = jnp.zeros_like(jprev_ref)
        out_ref[...] = jnp.zeros_like(out_ref)

    gts = gts_ref[...]                              # [bc, 1] f32
    tri = tri_ref[...]                              # [tp, tp] bf16
    bc, T = nkey_ref.shape
    tp = tri_ref.shape[0]
    k = T // tp                                     # static number of cumsum sub-blocks

    lane = jax.lax.broadcasted_iota(jnp.int32, (bc, tp), 1)
    lane_f = lane.astype(jnp.float32)
    tile_base = (t * T).astype(jnp.float32)         # global pixel offset of this tile

    carry = cs_ref[...]                             # running cumsum(fg) before this tile
    jprev = jprev_ref[...]                          # jaccard at previous global position
    loss_inc = jnp.zeros((bc, 1), jnp.float32)

    # Static unroll with *ref* slices: each iteration loads only a [bc, tp] sub-block, so
    # with bc in {8, 16} every temporary is 2-4 vregs and stays register resident (no spill
    # traffic); the only loop-carried state is three [bc, 1] vectors.
    for j in range(k):
        nkey = nkey_ref[:, j * tp:(j + 1) * tp]     # [bc, tp] f32, == -err
        fg16 = fg_ref[:, j * tp:(j + 1) * tp].astype(jnp.float32).astype(jnp.bfloat16)
        # inclusive cumsum of fg within the sub-block on the MXU + cross-block carry
        cs = jnp.dot(fg16, tri, preferred_element_type=jnp.float32) + carry
        pos = lane_f + (tile_base + float(j * tp) + 1.0)   # 1-based global position
        inter = gts - cs
        union = gts + (pos - cs)                    # gts + cumsum(1 - fg)
        inv = pl.reciprocal(union, approx=True)     # EUP slot instead of VALU divide
        inv = inv * (2.0 - union * inv)             # Newton step keeps 1e-4 tolerance
        jac = 1.0 - inter * inv
        # jaccard[1:] -= jaccard[:-1]  (boundary value carried across blocks/tiles)
        prev = jnp.where(lane == 0, jprev, pltpu.roll(jac, shift=1, axis=1))
        # err * (jac - prev) == nkey * (prev - jac)   since err = -nkey
        loss_inc = loss_inc + jnp.sum(nkey * (prev - jac), axis=-1, keepdims=True)
        carry = cs[:, tp - 1:tp]
        jprev = jac[:, tp - 1:tp]

    cs_ref[...] = carry
    jprev_ref[...] = jprev
    out_ref[...] = out_ref[...] + loss_inc          # VMEM-resident accumulator across t


def lovasz_rows(nkey_s, fg_s, gts, tri, bc_tile, tile_p):
    BCp, Pp = nkey_s.shape
    tp = tri.shape[0]
    return pl.pallas_call(
        _lovasz_rows_kernel,
        out_shape=jax.ShapeDtypeStruct((BCp, 1), jnp.float32),
        grid=(BCp // bc_tile, Pp // tile_p),        # reduction (pixel) axis last
        in_specs=[pl.BlockSpec((bc_tile, tile_p), lambda r, t: (r, t)),
                  pl.BlockSpec((bc_tile, tile_p), lambda r, t: (r, t)),
                  pl.BlockSpec((bc_tile, 1), lambda r, t: (r, 0)),
                  pl.BlockSpec((tp, tp), lambda r, t: (0, 0))],
        out_specs=pl.BlockSpec((bc_tile, 1), lambda r, t: (r, 0)),
        scratch_shapes=[pltpu.VMEM((bc_tile, 1), jnp.float32),   # cumsum(fg) carry
                        pltpu.VMEM((bc_tile, 1), jnp.float32)],  # previous jaccard value
        # NOTE: pipeline_mode=pl.Buffered(3) on the two big inputs is a cheap follow-up sweep
        # once compute drops further; default double-buffering kept here.
        compiler_params=pltpu.CompilerParams(
            dimension_semantics=("parallel", "arbitrary"),  # BC rows shard across TCs (v7x)
            vmem_limit_bytes=48 * 1024 * 1024),
    )(nkey_s, fg_s, gts, tri)


# ----------------------------------------------------------------------------
# Module forward (ignore_index=None, only_present=True — the module defaults)
# ----------------------------------------------------------------------------
def lovasz_softmax(logits, labels, ignore_index=None, only_present=True):
    # TODO(synk): ignore_index masking makes the pixel count data-dependent (ragged);
    # only the default ignore_index=None path is implemented.
    assert ignore_index is None and only_present
    B, C, H, W = logits.shape
    P = H * W
    assert P < (1 << 24), "f32 pixel positions lose integer exactness beyond 2^24"

    tp = _cumsum_block_size()                      # 128 on v5e, 256 on v6e/v7x
    if P >= 16384:
        tile_p2 = 16384                            # kernel-2 pixel tile (reduction axis)
        Pp = _round_up(P, tile_p2)
        tile_p1 = 8192                             # kernel-1 pixel tile (decoupled, large)
        while C * tile_p1 * 4 > (6 << 20) and tile_p1 > 2048:
            tile_p1 //= 2                          # keep kernel-1 working set v7x-safe
    else:
        Pp = _round_up(P, tp)
        tile_p1 = tile_p2 = Pp

    logits3 = logits.reshape(B, C, P).astype(jnp.float32)   # free view of NCHW
    labels3 = labels.reshape(B, 1, P).astype(jnp.int32)
    if Pp != P:
        logits3 = jnp.pad(logits3, ((0, 0), (0, 0), (0, Pp - P)))
        labels3 = jnp.pad(labels3, ((0, 0), (0, 0), (0, Pp - P)), constant_values=-1)

    # Kernel 1: fused softmax + one-hot error, already negated as the sort key
    nkey = softmax_err(logits3, labels3, tile_p1).reshape(B * C, Pp)

    # One-hot ground truth as int8 (cheap fused XLA compare on the small labels array) and
    # the per-(batch, class) foreground pixel counts.
    cls = jnp.arange(C, dtype=jnp.int32)
    fg = (labels3 == cls[None, :, None]).astype(jnp.int8).reshape(B * C, Pp)
    gts = jnp.sum(fg.astype(jnp.int32), axis=-1, keepdims=True).astype(jnp.float32)

    # TODO(synk): descending sort (torch.sort) has no Pallas TPU lowering; done in XLA.
    # Sorting the int8 fg as the value (instead of the f32 signed diff) cuts the sort's value
    # traffic 4x and removes abs/compare from kernel 2's hot loop.
    nkey_s, fg_s = jax.lax.sort_key_val(nkey, fg, dimension=-1)

    BC = B * C
    BCp = _round_up(BC, 8)
    bc_tile = 16 if BCp % 16 == 0 else 8
    if BCp != BC:                                   # padded rows: gts=0, err=0 -> loss 0
        nkey_s = jnp.pad(nkey_s, ((0, BCp - BC), (0, 0)))
        fg_s = jnp.pad(fg_s, ((0, BCp - BC), (0, 0)))
        gts_k = jnp.pad(gts, ((0, BCp - BC), (0, 0)))
    else:
        gts_k = gts

    # precomputed cumsum operator (0/1 values -> exact in bf16 with f32 accumulation)
    tri = jnp.triu(jnp.ones((tp, tp), jnp.float32)).astype(jnp.bfloat16)

    loss_rows = lovasz_rows(nkey_s, fg_s, gts_k, tri, bc_tile, tile_p2)   # [BCp, 1]

    # present-class mask + class/batch averaging on the tiny [B, C] result (plain JAX)
    loss_bc = loss_rows[:BC, 0].reshape(B, C)
    present = gts[:, 0].reshape(B, C) > 0.0
    per_batch = (jnp.sum(jnp.where(present, loss_bc, 0.0), axis=1)
                 / jnp.sum(present.astype(jnp.float32), axis=1))
    return jnp.mean(per_batch)


# ----------------------------------------------------------------------------
# Pure-JAX reference (mirrors the PyTorch code) for a sanity check
# ----------------------------------------------------------------------------
def _reference(logits, labels):
    B, C, H, W = logits.shape
    probas = jax.nn.softmax(logits.astype(jnp.float32), axis=1)
    total = 0.0
    for b in range(B):
        prb = probas[b].reshape(C, -1).T          # [P, C]
        lbl = labels[b].reshape(-1)
        loss = 0.0
        cnt = 0
        for c in range(C):
            fg = (lbl == c).astype(jnp.float32)
            if float(fg.sum()) == 0:
                continue
            errors = jnp.abs(fg - prb[:, c])
            order = jnp.argsort(-errors)
            es = errors[order]
            fs = fg[order]
            g = fs.sum()
            inter = g - jnp.cumsum(fs)
            union = g + jnp.cumsum(1.0 - fs)
            jac = 1.0 - inter / union
            jac = jnp.concatenate([jac[:1], jac[1:] - jac[:-1]])
            loss = loss + jnp.dot(es, jac)
            cnt += 1
        total = total + loss / cnt
    return total / B


if __name__ == "__main__":
    key = jax.random.PRNGKey(0)
    k1, k2 = jax.random.split(key)
    B, C, H, W = 2, 4, 16, 16
    logits = jax.random.normal(k1, (B, C, H, W), dtype=jnp.float32)
    labels = jax.random.randint(k2, (B, H, W), 0, C, dtype=jnp.int32)

    out = lovasz_softmax(logits, labels)
    out = jax.block_until_ready(out)

    ref = _reference(logits, labels)
    np.testing.assert_allclose(np.asarray(out), np.asarray(ref), rtol=1e-4, atol=1e-4)
    print("KERNEL_OK")
</pallas_src>

<mosaic_0001>
module attributes {stable_mosaic.version = 11 : i64} {
  func.func @_softmax_err_kernel(%arg0: i32, %arg1: i32, %arg2: memref<1x4x256xf32, #tpu.memory_space<vmem>>, %arg3: memref<1x1x256xi32, #tpu.memory_space<vmem>>, %arg4: memref<1x4x256xf32, #tpu.memory_space<vmem>>) attributes {dimension_semantics = [#tpu.dimension_semantics<parallel>, #tpu.dimension_semantics<parallel>], iteration_bounds = array<i64: 2, 1>, scalar_prefetch = 0 : i64, scratch_operands = 0 : i64, tpu.core_type = #tpu.core_type<tc>, window_params = [{transform_indices = @transform_0, window_bounds = array<i64: 1, 4, 256>}, {transform_indices = @transform_1, window_bounds = array<i64: 1, 1, 256>}, {transform_indices = @transform_2, window_bounds = array<i64: 1, 4, 256>}]} {
    %c0 = arith.constant 0 : index
    %c0_0 = arith.constant 0 : index
    %c0_1 = arith.constant 0 : index
    %0 = vector.load %arg2[%c0, %c0_0, %c0_1] : memref<1x4x256xf32, #tpu.memory_space<vmem>>, vector<1x4x256xf32>
    %1 = vector.shape_cast %0 : vector<1x4x256xf32> to vector<4x256xf32>
    %c0_2 = arith.constant 0 : index
    %c0_3 = arith.constant 0 : index
    %c0_4 = arith.constant 0 : index
    %2 = vector.load %arg3[%c0_2, %c0_3, %c0_4] : memref<1x1x256xi32, #tpu.memory_space<vmem>>, vector<1x1x256xi32>
    %3 = vector.shape_cast %2 : vector<1x1x256xi32> to vector<1x256xi32>
    %cst = arith.constant dense<0xFF800000> : vector<256xf32>
    %4 = vector.multi_reduction <maximumf>, %1, %cst [0] : vector<4x256xf32> to vector<256xf32>
    %5 = vector.shape_cast %4 : vector<256xf32> to vector<1x256xf32>
    %6 = vector.broadcast %5 : vector<1x256xf32> to vector<4x256xf32>
    %7 = arith.subf %1, %6 : vector<4x256xf32>
    %8 = math.exp %7 : vector<4x256xf32>
    %cst_5 = arith.constant dense<0.000000e+00> : vector<256xf32>
    %9 = vector.multi_reduction <add>, %8, %cst_5 [0] : vector<4x256xf32> to vector<256xf32>
    %10 = vector.shape_cast %9 : vector<256xf32> to vector<1x256xf32>
    %11 = tpu.reciprocal %10 {approx = true} : vector<1x256xf32> -> vector<1x256xf32>
    %12 = arith.mulf %10, %11 : vector<1x256xf32>
    %cst_6 = arith.constant 2.000000e+00 : f32
    %13 = vector.broadcast %cst_6 : f32 to vector<1x256xf32>
    %14 = arith.subf %13, %12 : vector<1x256xf32>
    %15 = arith.mulf %11, %14 : vector<1x256xf32>
    %16 = vector.broadcast %15 : vector<1x256xf32> to vector<4x256xf32>
    %17 = arith.mulf %8, %16 : vector<4x256xf32>
    %18 = tpu.iota {dimensions = array<i32: 0>} : vector<4x256xi32>
    %19 = vector.broadcast %3 : vector<1x256xi32> to vector<4x256xi32>
    %20 = arith.cmpi eq, %18, %19 : vector<4x256xi32>
    %21 = arith.extui %20 : vector<4x256xi1> to vector<4x256xi32>
    %22 = arith.sitofp %21 : vector<4x256xi32> to vector<4x256xf32>
    %23 = arith.subf %22, %17 : vector<4x256xf32>
    %24 = math.absf %23 : vector<4x256xf32>
    %c0_i32 = arith.constant 0 : i32
    %25 = vector.broadcast %c0_i32 : i32 to vector<1x256xi32>
    %26 = arith.cmpi sge, %3, %25 : vector<1x256xi32>
    %cst_7 = arith.constant 0.000000e+00 : f32
    %27 = vector.broadcast %cst_7 : f32 to vector<4x256xf32>
    %28 = arith.subf %27, %24 : vector<4x256xf32>
    %cst_8 = arith.constant 0.000000e+00 : f32
    %29 = vector.shape_cast %26 : vector<1x256xi1> to vector<1x256xi1>
    %30 = vector.broadcast %29 : vector<1x256xi1> to vector<4x256xi1>
    %31 = vector.broadcast %cst_8 : f32 to vector<4x256xf32>
    %32 = arith.select %30, %28, %31 : vector<4x256xi1>, vector<4x256xf32>
    %c0_9 = arith.constant 0 : index
    %c0_10 = arith.constant 0 : index
    %c0_11 = arith.constant 0 : index
    %33 = vector.load %arg4[%c0_9, %c0_10, %c0_11] : memref<1x4x256xf32, #tpu.memory_space<vmem>>, vector<1x4x256xf32>
    %34 = vector.shape_cast %33 : vector<1x4x256xf32> to vector<4x256xf32>
    %35 = vector.shape_cast %32 : vector<4x256xf32> to vector<1x4x256xf32>
    tpu.vector_store %arg4[%c0_9, %c0_10, %c0_11], %35 {strides = array<i32>} : memref<1x4x256xf32, #tpu.memory_space<vmem>>, vector<1x4x256xf32>,
    return
  }
  func.func @transform_0(%arg0: i32, %arg1: i32) -> (i32, i32, i32) {
    %c0_i32 = arith.constant 0 : i32
    %c0_i32_0 = arith.constant 0 : i32
    return %arg0, %c0_i32, %arg1 : i32, i32, i32
  }
  func.func @transform_1(%arg0: i32, %arg1: i32) -> (i32, i32, i32) {
    %c0_i32 = arith.constant 0 : i32
    %c0_i32_0 = arith.constant 0 : i32
    return %arg0, %c0_i32, %arg1 : i32, i32, i32
  }
  func.func @transform_2(%arg0: i32, %arg1: i32) -> (i32, i32, i32) {
    %c0_i32 = arith.constant 0 : i32
    %c0_i32_0 = arith.constant 0 : i32
    return %arg0, %c0_i32, %arg1 : i32, i32, i32
  }
}

</mosaic_0001>

<bundles_post_ra>
// kernel: tpu_custom_call.1
= control target key start
LH: loop header
LB: loop body
LE: loop exit
PB: predicated region body
PF: predicated region fallthrough
CT: control target
= control target key end

     0   :  { %7 = vsyncpa [#allocation3], 0  ;;  %s869_s0 = inlined_call_operand.hbm [shape: f32[2,4,256], index: 0, kind: input, shape index: {}]   ;;  %s870_s1 = inlined_call_operand.hbm [shape: s32[2,1,256], index: 1, kind: input, shape index: {}]   ;;  %s871_s2 = inlined_call_operand.hbm [shape: f32[2,4,256], index: 2, kind: output, shape index: {}]  }
   0x1   :  { %9 = vsyncpa [#allocation3 + $0x1], 0 }
   0x2   :  { %10 = vsyncpa [#allocation6], 0 }
   0x3   :  { %12 = vsyncpa [#allocation6 + $0x1], 0 }
   0x4   :  { %13 = vsyncpa [#allocation4], 0 }
   0x5   :  { %15 = vsyncpa [#allocation4 + $0x1], 0  ;;  %s717_s9 = smov 0   ;;  %s719_s10 = smov 0  }
   0x6   :  { %s721_s11 = smov 0   ;;  %s723_s12 = smov 0  }
   0x7   :  { %s725_s13 = smov 0   ;;  %s727_s14 = smov 0  }
   0x8 LB: > { %s455_s15 = sadd.s32 4294967295, %s698_s14   ;;  %s456_s16 = sadd.s32 4294967294, %s698_s14   ;;  %s698_s14 = sphi %s727_s14, %s21_s14   ;;  %s694_s13 = sphi %s725_s13, %s881_s13   ;;  %s690_s12 = sphi %s723_s12, %s880_s12   ;;  %s686_s11 = sphi %s721_s11, %s879_s11   ;;  %s682_s10 = sphi %s719_s10, %s878_s10   ;;  %s678_s9 = sphi %s717_s9, %s877_s9  }
   0x9   : > { %s33_s17 = sadd.s32 1, %s694_s13  ;;  %s42_s18 = sadd.s32 1, %s686_s11 }
   0xa   : > { %p35_p0 = scmp.ge.s32.totalorder %s33_s17, 2  ;;  %p49_p1 = scmp.ne.s32.totalorder %s686_s11, %s682_s10 }
   0xb   : > { %p50_p2 = scmp.eq.s32.totalorder %s698_s14, 0  ;;  %p55_p3 = scmp.ne.s32.totalorder %s682_s10, %s678_s9 }
   0xc   : > { %s883_s17 = smov (%p35_p0, %s33_s17), 0  ;;  %p56_p5 = scmp.eq.s32.totalorder %s455_s15, 0 }
   0xd   : > { %p758_p4 = por %p50_p2, %p49_p1  ;;  %s37_s20 = ssub.s32 %s694_s13, %s883_s17 }
   0xe   : > { %p109_p6 = scmp.eq.s32.totalorder %s455_s15, 1  ;;  %p40_p7 = scmp.eq.s32.totalorder %s37_s20, 0 }
   0xf   : > { %p764_p8 = por %p56_p5, %p55_p3  ;;  %p115_p10 = scmp.eq.s32.totalorder %s456_s16, 1 }
  0x10   : > { %p768_p9 = por %p109_p6, %p49_p1  ;;  %p458_p12 = scmp.ge.s32.totalorder %s698_s14, 2 }
  0x11   : > { %s773_s23 = scalar_select %p40_p7, %s686_s11, %s42_s18  }
  0x12   : > { %p775_p11 = por %p115_p10, %p55_p3  ;;  %p494_p13 = scmp.lt.s32.totalorder %s698_s14, 2 }
  0x13   : > { %s135_s25 = sand.u32 1, %s686_s11   ;;  %s475_s27 = sshll.u32 %s694_s13, 3 }
  0x14   : > { %s459_s26 = sshll.u32 %s135_s25, 3  ;;  %s146_s30 = scalar_lea.hbm %s869_s0, %s475_s27 }
  0x15   : > { %s139_s3 = scalar_lea.vmem [#allocation2], %s459_s26  ;;  %s148_s5 = sshll.u32 %s146_s30, 4  ;;  %s149_s5 = int_to_ptr.hbm [resolvable:$true] %s148_s5 }
  0x16   : > { %s150_s4 = sshll.u32 %s139_s3, 4  ;;  %p788_p0 = pnand %p494_p13, %p758_p4  ;;  %s151_s4 = int_to_ptr.vmem [resolvable:$true] %s150_s4 }
  0x17   : > { %p464_p1 = scmp.ge.s32.totalorder %s698_s14, 1  ;;  %p176_p2 = scmp.lt.s32.totalorder %s698_s14, 3 }
  0x18   : > { %s136_s7 = scalar_lea.sflag [#allocation3], %s135_s25  ;;  %s462_s8 = sshll.u32 %s135_s25, 1 }
  0x19   : > { %486 = dma.hbm_to_vmem [thread:$0]  (!%p788_p0), %s149_s5, 128, %s151_s4, %s136_s7  }
  0x1a   : > { %p177_p3 = pnand %p464_p1, %p176_p2  ;;  %s463_s15 = sshll.u32 %s694_s13, 1 }
  0x1b   : > { %s167_s20 = scalar_lea.hbm %s870_s1, %s463_s15  ;;  %s161_s26 = scalar_lea.vmem [#allocation5], %s462_s8 }
  0x1c   : > { %s171_s19 = sshll.u32 %s161_s26, 4  ;;  %s169_s27 = sshll.u32 %s167_s20, 4  ;;  %s172_s19 = int_to_ptr.vmem [resolvable:$true] %s171_s19  ;;  %s170_s27 = int_to_ptr.hbm [resolvable:$true] %s169_s27 }
  0x1d   : > { %s158_s28 = scalar_lea.sflag [#allocation6], %s135_s25  ;;  %180 = sbr.rel (%p177_p3) target bundleno = 135 (0x87), region = 28 }
  0x1e   : > { %489 = dma.hbm_to_vmem [thread:$0]  (!%p788_p0), %s170_s27, 32, %s172_s19, %s158_s28  }
  0x1f   : > { %s803_s29 = sand.u32 (!%p177_p3), 1, %s682_s10  }
  0x20   : > { %s465_s30 = sshll.u32 (!%p177_p3), %s803_s29, 3  ;;  %s183_s3 = scalar_lea.sflag (!%p177_p3), [#allocation3], %s803_s29 }
  0x21   : > { %s186_s4 = scalar_lea.vmem (!%p177_p3), [#allocation2], %s465_s30 }
  0x22   : > { %665 = dma.done.wait (%p764_p8), %s183_s3, 128  }
  0x23   : > { %667 = vsyncadd (%p764_p8), %s183_s3, 4294967168  ;;  %s466_s25 = sshll.u32 %s803_s29, 1  ;;  %s193_s5 = scalar_lea.sflag [#allocation6], %s803_s29 }
  0x24   : > { %s815_s6 = scalar_lea.vmem [#allocation5], %s466_s25 }
  0x25   : > { %669 = dma.done.wait (%p764_p8), %s193_s5, 32  }
  0x26   : > { %671 = vsyncadd (%p764_p8), %s193_s5, 4294967264  ;;  %v226_v0 = vld [vmem:[%s186_s4] sm:$0xff]  ;;  %vm234_vm0 = vcmask 1043456   ;;  %v291_v45 = vlaneseq  ;;  %v227_v48 = vld [vmem:[%s815_s6] sm:$0x3]  ;;  %v700_v54 = vmov 0  }
  0x27   : > { %229 = vst [vmem:[#allocation1] ss:$2 sm:$0xff] %v226_v0  ;;  %v293_v52 = vperm.slane %v227_v48, 0  ;;  %v294_v53 = vperm.slane %v227_v48, 1  ;;  %vm311_vm1 = vcmp.ge.s32.totalorder %v227_v48, 0  ;;  %v701_v56 = vmov 0.0  }
  0x28   : > { %v292_v51 = vshrl.u32 %v291_v45, 7  ;;  %v314_v55 = vsel %vm311_vm1, 1, %v700_v54  ;;  %s476_s21 = sshll.u32 %s690_s12, 3  ;;  %s222_s16 = scalar_lea.vmem [#allocation7], %s465_s30 }
  0x29   : > { %v316_v59 = vperm.slane %v314_v55, 1  ;;  %s341_s15 = scalar_lea.hbm %s871_s2, %s476_s21  ;;  %s343_s12 = sshll.u32 %s222_s16, 4  ;;  %s344_s12 = int_to_ptr.vmem [resolvable:$true] %s343_s12 }
  0x2a   : > { %vm295_vm2 = vcmp.eq.s32.totalorder %v292_v51, %v293_v52  ;;  %vm296_vm3 = vcmp.eq.s32.totalorder %v292_v51, %v294_v53  ;;  %s345_s18 = sshll.u32 %s341_s15, 4  ;;  %s328_s20 = scalar_lea.sflag [#allocation4], %s803_s29  ;;  %s346_s18 = int_to_ptr.hbm [resolvable:$true] %s345_s18 }
  0x2b   : > { %v468_v57 = vsel %vm295_vm2, 1.0, %v701_v56  ;;  %v469_v58 = vsel %vm296_vm3, 1.0, %v701_v56  ;;  %vm318_vm4 = vcmp.eq.s32.totalorder %v316_v59, 1  ;;  %s626_s26 = sshra.s32 %s346_s18, 4  ;;  %s632_s30 = scalar_lea.hbm %s871_s2, 16  ;;  %s627_s26 = int_to_ptr.hbm [resolvable:$true] %s626_s26 }
  0x2c   : > { %s628_s19 = scalar_lea.hbm %s627_s26, 8  ;;  %p633_p7 = scmp.lt.s32.totalorder %s627_s26, %s871_s2 }
  0x2d   : > { %p629_p4 = scmp.ne.s32.totalorder %s627_s26, %s628_s19  ;;  %p634_p8 = scmp.lt.s32.totalorder %s632_s30, %s628_s19 }
  0x2e   : > { %v230_v1 = vld.sshfl [vmem:[#allocation1] sm:$0xff pattern:$0x75316420]  ;;  %v231_v2 = vld.sshfl [vmem:[#allocation1 + $0x8] sm:$0xff pattern:$0x75316420] }
  0x2f   : > { %v235_v3 = vsel %vm234_vm0, %v230_v1, -inf  ;;  %v242_v4 = vsel %vm234_vm0, %v231_v2, -inf  ;;  %p630_p5 = pnand %p629_p4, %p768_p9  ;;  %p635_p10 = por %p634_p8, %p633_p7 }
  0x30   : > { %v236_v5 = vrot.slane %v235_v3, 4  ;;  %v243_v6 = vrot.slane %v242_v4, 4 }
  0x31   : > { %p631_p6 = pneg %p630_p5 }
  0x32   : > { %v237_v7 = vmax.f32 %v235_v3, %v236_v5  ;;  %v244_v8 = vmax.f32 %v242_v4, %v243_v6 }
  0x33   : > { %p636_p13 = pnand %p635_p10, %p631_p6 }
  0x34   : > { %v238_v9 = vrot.slane %v237_v7, 2  ;;  %v245_v10 = vrot.slane %v244_v8, 2 }
  0x36   : > { %v239_v11 = vmax.f32 %v237_v7, %v238_v9  ;;  %v246_v12 = vmax.f32 %v244_v8, %v245_v10 }
  0x38   : > { %v240_v13 = vrot.slane %v239_v11, 1  ;;  %v247_v14 = vrot.slane %v246_v12, 1 }
  0x3a   : > { %v248_v15 = vmax.f32 %v246_v12, %v247_v14  ;;  %v241_v16 = vmax.f32 %v239_v11, %v240_v13 }
  0x3c   : > { %v251_v17 = vrot.slane %v248_v15, 4 }
  0x3e   : > { %v252_v18 = vsel %vm234_vm0, %v241_v16, %v251_v17 }
  0x3f   : > { %v254_v19 = vsub.f32 %v226_v0, %v252_v18  ;;  %v315_v0 = vperm.slane %v314_v55, 0 }
  0x41   : > { %v255_v20 = vmul.f32 1.442695, %v254_v19  ;;  %vm317_vm5 = vcmp.eq.s32.totalorder %v315_v0, 1 }
  0x43   : > { %546 = vpow2.f32 %v255_v20 }
  0x49   : > { %v547_v21 = vpop.eup %546 }
  0x4a   : > { %258 = vst [vmem:[#allocation1] ss:$2 sm:$0xff] %v547_v21 }
  0x51   : > { %v259_v22 = vld.sshfl [vmem:[#allocation1] sm:$0xff pattern:$0x75316420]  ;;  %v260_v23 = vld.sshfl [vmem:[#allocation1 + $0x8] sm:$0xff pattern:$0x75316420] }
  0x52   : > { %v263_v24 = vsel %vm234_vm0, %v259_v22, 0.0  ;;  %v270_v25 = vsel %vm234_vm0, %v260_v23, 0.0 }
  0x53   : > { %v264_v26 = vrot.slane %v263_v24, 4  ;;  %v271_v27 = vrot.slane %v270_v25, 4 }
  0x55   : > { %v265_v28 = vadd.f32 %v264_v26, %v263_v24  ;;  %v272_v29 = vadd.f32 %v271_v27, %v270_v25 }
  0x57   : > { %v266_v30 = vrot.slane %v265_v28, 2  ;;  %v273_v31 = vrot.slane %v272_v29, 2 }
  0x59   : > { %v267_v32 = vadd.f32 %v266_v30, %v265_v28  ;;  %v274_v33 = vadd.f32 %v273_v31, %v272_v29 }
  0x5b   : > { %v268_v34 = vrot.slane %v267_v32, 1  ;;  %v275_v35 = vrot.slane %v274_v33, 1 }
  0x5d   : > { %v269_v36 = vadd.f32 %v268_v34, %v267_v32  ;;  %v276_v37 = vadd.f32 %v275_v35, %v274_v33 }
  0x5f   : > { %548 = vrcp.f32 %v269_v36 }
  0x60   : > { %550 = vrcp.f32 %v276_v37 }
  0x65   : > { %v549_v38 = vpop.eup %548 }
  0x66   : > { %v551_v39 = vpop.eup %550  ;;  %v279_v40 = vmul.f32 %v549_v38, %v269_v36 }
  0x67   : > { %v280_v41 = vmul.f32 %v551_v39, %v276_v37 }
  0x68   : > { %v281_v42 = vsub.f32 2.0, %v279_v40 }
  0x69   : > { %v282_v43 = vsub.f32 2.0, %v280_v41 }
  0x6a   : > { %v283_v46 = vmul.f32 %v549_v38, %v281_v42 }
  0x6b   : > { %v284_v44 = vmul.f32 %v551_v39, %v282_v43 }
  0x6d   : > { %v287_v47 = vrot.slane %v284_v44, 4 }
  0x6f   : > { %v288_v49 = vsel %vm234_vm0, %v283_v46, %v287_v47 }
  0x70   : > { %v290_v50 = vmul.f32 %v547_v21, %v288_v49 }
  0x72   : > { %302 = vst [vmem:[#allocation1] ss:$2 sm:$0xff] %v290_v50 }
  0x79   : > { %v303_v60 = vld.sshfl [vmem:[#allocation1] sm:$0xff pattern:$0x75316420]  ;;  %v304_v61 = vld.sshfl [vmem:[#allocation1 + $0x8] sm:$0xff pattern:$0x75316420] }
  0x7a   : > { %v307_v62 = vsub.f32 %v468_v57, %v303_v60  ;;  %v308_v63 = vsub.f32 %v469_v58, %v304_v61 }
  0x7c   : > { %v309_v1 = vand.u32 2147483647, %v307_v62  ;;  %v310_v2 = vand.u32 2147483647, %v308_v63 }
  0x7e   : > { %v312_v3 = vsub.f32 0.0, %v309_v1  ;;  %v313_v4 = vsub.f32 0.0, %v310_v2 }
  0x80   : > { %v320_v5 = vsel %vm318_vm4, %v313_v4, 0.0  ;;  %v319_v7 = vsel %vm317_vm5, %v312_v3, 0.0 }
  0x81   : > { %v323_v6 = vrot.slane %v320_v5, 4 }
  0x83   : > { %v324_v8 = vsel %vm234_vm0, %v319_v7, %v323_v6 }
  0x84   : > { %326 = vst [vmem:[%s222_s16] sm:$0xff] %v324_v8 }
  0x85   : > { %639 = shalt.err (!%p636_p13)
}
  0x86   : > { %481 = dma.vmem_to_hbm [thread:$0]  (%p768_p9), %s344_s12, 128, %s346_s18, %s328_s20  }
  0x87 PF: > { %s357_s29 = sand.u32 1, %s678_s9   ;;  %p491_p0 = pnand %p458_p12, %p775_p11 }
  0x88   : > { %s358_s25 = scalar_lea.sflag [#allocation4], %s357_s29 }
  0x89   : > { %p492_p1 = pneg %p491_p0 }
  0x8b   : > { %673 = dma.done.wait (%p492_p1), %s358_s25, 128  }
  0x8c   : > { %675 = vsyncadd (%p492_p1), %s358_s25, 4294967168  ;;  %s21_s14 = sadd.s32 1, %s698_s14   ;;  %s877_s9 = smov %s682_s10 }
  0x8d   : > { %p18_p2 = scmp.ge.s32.totalorder %s21_s14, 4   ;;  %s878_s10 = smov %s686_s11 }
  0x8e   : > { %s879_s11 = smov %s773_s23  ;;  %s880_s12 = smov %s694_s13 }
  0x8f   : > { %s881_s13 = smov %s883_s17  ;;  %20 = sbr.rel (!%p18_p2) target bundleno = 8 (0x8), region = 86 }
  0x94   :  { %364 = vsyncpa [#allocation3], 1 }
  0x95   :  { %366 = vsyncpa [#allocation3 + $0x1], 1 }
  0x96   :  { %367 = vsyncpa [#allocation6], 1 }
  0x97   :  { %369 = vsyncpa [#allocation6 + $0x1], 1 }
  0x98   :  { %370 = vsyncpa [#allocation4], 1 }
  0x99   :  { %372 = vsyncpa [#allocation4 + $0x1], 1 }

</bundles_post_ra>
